<compile_context>
chip_gen: v5e
topology: v5e:2x2
jax: 0.10.0
libtpu: 0.0.40
codegen_flags: <defaults>
</compile_context>

<pallas_src>
import functools
import math

import jax
import jax.numpy as jnp
from jax.experimental import pallas as pl
from jax.experimental.pallas import tpu as pltpu


# --------------------------------- kernel ---------------------------------

def _gcn_kernel(x_ref, adj_ref, wt_ref, o_ref, *, dot_dtype):
    """Fused GCN for one batch block: relu((A @ x) @ W.T)."""
    x = x_ref[...]                                   # (bb, N, F_in)  f32
    adj = adj_ref[...]                               # (N, N)         f32
    wt = wt_ref[...]                                 # (F_in, F_out)  f32
    bb, n, f_in = x.shape
    f_out = wt.shape[-1]

    # MXU operands optionally in bf16 (v6e/v7x), accumulation always f32.
    xc = x.astype(dot_dtype)
    adjc = jnp.broadcast_to(adj.astype(dot_dtype), (bb, n, n))
    wtc = wt.astype(dot_dtype)

    # Spatial aggregation for the whole block in one batched contraction:
    #   ax[b] = A @ x[b]
    ax = jnp.einsum("bnm,bmf->bnf", adjc, xc,
                    preferred_element_type=jnp.float32)      # (bb, N, F_in) f32

    # Theta projection for the whole block at once: (bb*N, F_in) @ (F_in, F_out)
    y = jnp.dot(ax.astype(dot_dtype).reshape(bb * n, f_in), wtc,
                preferred_element_type=jnp.float32)          # (bb*N, F_out) f32

    # ReLU in f32 (no bf16 elementwise), lane-dense store (F_out last dim).
    o_ref[...] = jnp.maximum(y, 0.0).reshape(bb, n, f_out)


# --------------------------------- wrapper ---------------------------------

def gcn_forward(x, sym_norm_adj, theta_weight, *,
                dot_dtype=jnp.float32, num_blocks=None):
    """
    x:            (B, N, F_in)   float32
    sym_norm_adj: (N, N)         float32  (D^-1/2 (A+I) D^-1/2)
    theta_weight: (F_out, F_in)  float32  (nn.Linear weight, bias=False)
    returns       (B, N, F_out)  float32
    """
    B, N, F_in = x.shape
    F_out, F_in_w = theta_weight.shape
    assert F_in_w == F_in

    # nn.Linear applies z @ W.T; pre-transpose once in the wrapper.
    wt = theta_weight.T                                      # (F_in, F_out)

    if num_blocks is None:
        # 2-way "parallel" grid feeds both v7x TensorCores; single step otherwise.
        num_blocks = 2 if (B >= 2 and B % 2 == 0) else 1
    assert B % num_blocks == 0
    bb = B // num_blocks

    kernel = functools.partial(_gcn_kernel, dot_dtype=dot_dtype)
    return pl.pallas_call(
        kernel,
        out_shape=jax.ShapeDtypeStruct((B, N, F_out), jnp.float32),
        grid=(num_blocks,),
        in_specs=[
            pl.BlockSpec((bb, N, F_in), lambda i: (i, 0, 0)),   # batch block of x
            pl.BlockSpec((N, N), lambda i: (0, 0)),             # adjacency (shared)
            pl.BlockSpec((F_in, F_out), lambda i: (0, 0)),      # Theta weight (shared)
        ],
        out_specs=pl.BlockSpec((bb, N, F_out), lambda i: (i, 0, 0)),
        compiler_params=pltpu.CompilerParams(
            dimension_semantics=("parallel",)),
    )(x, sym_norm_adj, wt)


# --------------------------- deterministic inputs ---------------------------

def _sym_norm_adj(n_nodes):
    """Ring graph + self loops, symmetric normalization D^-1/2 (A+I) D^-1/2."""
    idx = jnp.arange(n_nodes)
    a = jnp.zeros((n_nodes, n_nodes), jnp.float32)
    a = a.at[idx, (idx + 1) % n_nodes].set(1.0)
    a = a.at[(idx + 1) % n_nodes, idx].set(1.0)
    a = a + jnp.eye(n_nodes, dtype=jnp.float32)
    d = jnp.sum(a, axis=-1)
    dinv = 1.0 / jnp.sqrt(d)
    return a * dinv[:, None] * dinv[None, :]


# ------------------------------------ main ------------------------------------

if __name__ == "__main__":
    key = jax.random.PRNGKey(0)
    B, N, F_in, F_out = 4, 16, 32, 128   # batch, nodes, in-features, out-features

    kx, kw = jax.random.split(key, 2)
    x = jax.random.normal(kx, (B, N, F_in), jnp.float32)
    theta_w = jax.random.normal(kw, (F_out, F_in), jnp.float32) * (1.0 / math.sqrt(F_in))
    adj = _sym_norm_adj(N)

    # f32-operand path (exact semantics of the PyTorch module).
    fwd = jax.jit(gcn_forward)
    out = jax.block_until_ready(fwd(x, adj, theta_w))

    ref = jax.nn.relu(jnp.einsum("nm,bmf->bnf", adj, x) @ theta_w.T)
    assert out.shape == (B, N, F_out), out.shape
    assert bool(jnp.all(jnp.isfinite(out)))
    assert bool(jnp.allclose(out, ref, atol=1e-4, rtol=1e-4))

    # bf16 MXU-operand path (v6e/v7x throughput); f32 accumulation keeps it close.
    fwd_bf16 = jax.jit(functools.partial(gcn_forward, dot_dtype=jnp.bfloat16))
    out_bf16 = jax.block_until_ready(fwd_bf16(x, adj, theta_w))
    assert bool(jnp.all(jnp.isfinite(out_bf16)))
    assert bool(jnp.allclose(out_bf16, ref, atol=5e-2, rtol=5e-2))

    print("KERNEL_OK")
</pallas_src>

<mosaic_0001>
module attributes {stable_mosaic.version = 11 : i64} {
  func.func @_gcn_kernel(%arg0: i32, %arg1: memref<2x16x32xf32, #tpu.memory_space<vmem>>, %arg2: memref<16x16xf32, #tpu.memory_space<vmem>>, %arg3: memref<32x128xf32, #tpu.memory_space<vmem>>, %arg4: memref<2x16x128xf32, #tpu.memory_space<vmem>>) attributes {dimension_semantics = [#tpu.dimension_semantics<parallel>], iteration_bounds = array<i64: 2>, scalar_prefetch = 0 : i64, scratch_operands = 0 : i64, tpu.core_type = #tpu.core_type<tc>, window_params = [{transform_indices = @transform_0, window_bounds = array<i64: 2, 16, 32>}, {pipeline_mode = #tpu.pipeline_mode<synchronous>, transform_indices = @transform_1, window_bounds = array<i64: 16, 16>}, {pipeline_mode = #tpu.pipeline_mode<synchronous>, transform_indices = @transform_2, window_bounds = array<i64: 32, 128>}, {transform_indices = @transform_3, window_bounds = array<i64: 2, 16, 128>}]} {
    %c0 = arith.constant 0 : index
    %c0_0 = arith.constant 0 : index
    %c0_1 = arith.constant 0 : index
    %0 = vector.load %arg1[%c0, %c0_0, %c0_1] : memref<2x16x32xf32, #tpu.memory_space<vmem>>, vector<2x16x32xf32>
    %c0_2 = arith.constant 0 : index
    %c0_3 = arith.constant 0 : index
    %1 = vector.load %arg2[%c0_2, %c0_3] : memref<16x16xf32, #tpu.memory_space<vmem>>, vector<16x16xf32>
    %c0_4 = arith.constant 0 : index
    %c0_5 = arith.constant 0 : index
    %2 = vector.load %arg3[%c0_4, %c0_5] : memref<32x128xf32, #tpu.memory_space<vmem>>, vector<32x128xf32>
    %3 = vector.shape_cast %1 : vector<16x16xf32> to vector<1x16x16xf32>
    %4 = vector.broadcast %3 : vector<1x16x16xf32> to vector<2x16x16xf32>
    "tpu.trace_start"() <{level = 10 : i32, message = "bnm,bmf->bnf"}> : () -> ()
    %cst = arith.constant dense<0.000000e+00> : vector<2x16x32xf32>
    %5 = tpu.matmul %4, %0, %cst {dimension_numbers = #tpu.dot_dimension_numbers<[2], [1], [1], [2], [0, 0, 0, 1, 1, 2], [0], [0]>} : vector<2x16x16xf32>, vector<2x16x32xf32>, vector<2x16x32xf32> -> vector<2x16x32xf32>
    "tpu.trace_stop"() : () -> ()
    %6 = vector.shape_cast %5 : vector<2x16x32xf32> to vector<32x32xf32>
    %cst_6 = arith.constant dense<0.000000e+00> : vector<32x128xf32>
    %7 = tpu.matmul %6, %2, %cst_6 {dimension_numbers = #tpu.dot_dimension_numbers<[1], [0], [0], [1], [0, 0, 1, 1], [], []>} : vector<32x32xf32>, vector<32x128xf32>, vector<32x128xf32> -> vector<32x128xf32>
    %cst_7 = arith.constant 0.000000e+00 : f32
    %8 = vector.broadcast %cst_7 : f32 to vector<32x128xf32>
    %9 = arith.maximumf %7, %8 : vector<32x128xf32>
    %10 = vector.shape_cast %9 : vector<32x128xf32> to vector<2x16x128xf32>
    %c0_8 = arith.constant 0 : index
    %c0_9 = arith.constant 0 : index
    %c0_10 = arith.constant 0 : index
    %11 = vector.load %arg4[%c0_8, %c0_9, %c0_10] : memref<2x16x128xf32, #tpu.memory_space<vmem>>, vector<2x16x128xf32>
    tpu.vector_store %arg4[%c0_8, %c0_9, %c0_10], %10 {strides = array<i32>} : memref<2x16x128xf32, #tpu.memory_space<vmem>>, vector<2x16x128xf32>,
    return
  }
  func.func @transform_0(%arg0: i32) -> (i32, i32, i32) {
    %c0_i32 = arith.constant 0 : i32
    %c0_i32_0 = arith.constant 0 : i32
    %c0_i32_1 = arith.constant 0 : i32
    return %arg0, %c0_i32, %c0_i32_0 : i32, i32, i32
  }
  func.func @transform_1(%arg0: i32) -> (i32, i32) {
    %c0_i32 = arith.constant 0 : i32
    %c0_i32_0 = arith.constant 0 : i32
    %c0_i32_1 = arith.constant 0 : i32
    return %c0_i32, %c0_i32_0 : i32, i32
  }
  func.func @transform_2(%arg0: i32) -> (i32, i32) {
    %c0_i32 = arith.constant 0 : i32
    %c0_i32_0 = arith.constant 0 : i32
    %c0_i32_1 = arith.constant 0 : i32
    return %c0_i32, %c0_i32_0 : i32, i32
  }
  func.func @transform_3(%arg0: i32) -> (i32, i32, i32) {
    %c0_i32 = arith.constant 0 : i32
    %c0_i32_0 = arith.constant 0 : i32
    %c0_i32_1 = arith.constant 0 : i32
    return %arg0, %c0_i32, %c0_i32_0 : i32, i32, i32
  }
}

</mosaic_0001>

<bundles_post_ra>
// kernel: gcn_forward.1
= control target key start
LH: loop header
LB: loop body
LE: loop exit
PB: predicated region body
PF: predicated region fallthrough
CT: control target
= control target key end

     0   :  { %8 = vsyncpa [#allocation3], 0  ;;  %s902_s0 = inlined_call_operand.hbm [shape: f32[4,16,32], index: 0, kind: input, shape index: {}]   ;;  %s903_s1 = inlined_call_operand.hbm [shape: f32[16,16], index: 1, kind: input, shape index: {}]   ;;  %s904_s2 = inlined_call_operand.hbm [shape: f32[32,128], index: 2, kind: input, shape index: {}]   ;;  %s905_s3 = inlined_call_operand.hbm [shape: f32[4,16,128], index: 3, kind: output, shape index: {}]  }
   0x1   :  { %10 = vsyncpa [#allocation3 + $0x1], 0 }
   0x2   :  { %11 = vsyncpa [#allocation6], 0 }
   0x3   :  { %12 = vsyncpa [#allocation4], 0 }
   0x4   :  { %14 = vsyncpa [#allocation4 + $0x1], 0  ;;  %s744_s12 = smov 0   ;;  %s746_s13 = smov 0  }
   0x5   :  { %s748_s14 = smov 0   ;;  %s750_s15 = smov 0  }
   0x6 LB: > { %s765_s16 = sadd.s32 4294967295, %s716_s15   ;;  %s449_s17 = sadd.s32 4294967294, %s716_s15   ;;  %s716_s15 = sphi %s750_s15, %s915_s15   ;;  %s712_s14 = sphi %s748_s14, %s914_s14   ;;  %s708_s13 = sphi %s746_s13, %s913_s13   ;;  %s704_s12 = sphi %s744_s12, %s912_s12  }
   0x7   : > { %p40_p0 = scmp.ne.s32.totalorder %s708_s13, %s704_s12  ;;  %p41_p1 = scmp.eq.s32.totalorder %s765_s16, 0 }
   0x8   : > { %p106_p2 = scmp.eq.s32.totalorder %s765_s16, 1  ;;  %p112_p3 = scmp.eq.s32.totalorder %s449_s17, 1 }
   0x9   : > { %p774_p4 = por %p41_p1, %p40_p0  ;;  %p450_p5 = scmp.ge.s32.totalorder %s716_s15, 1 }
   0xa   : > { %p779_p6 = por %p112_p3, %p40_p0  ;;  %p119_p7 = scmp.lt.s32.totalorder %s716_s15, 3 }
   0xb   : > { %s130_s22 = sshll.u32 %s903_s1, 4  ;;  %s718_s24 = smov [#allocation5]   ;;  %s131_s22 = int_to_ptr.hbm [resolvable:$true] %s130_s22 }
   0xc   : > { %p787_p8 = pnand %p450_p5, %p119_p7  ;;  %s132_s25 = sshll.u32 %s718_s24, 4  ;;  %s133_s25 = int_to_ptr.vmem [resolvable:$true] %s132_s25 }
   0xd   : > { %s144_s28 = sshll.u32 %s904_s2, 4  ;;  %s719_s29 = smov 128   ;;  %s145_s28 = int_to_ptr.hbm [resolvable:$true] %s144_s28 }
   0xe   : > { %p497_p9 = pneg %p787_p8  ;;  %s720_s30 = smov 8  }
   0xf   : > { %s721_s4 = smov [#allocation7]   ;;  %s806_s6 = sadd.s32 1, %s716_s15  }
  0x10   : > { %p498_p10 = pnand %p497_p9, %p41_p1  ;;  %s146_s5 = sshll.u32 %s721_s4, 4  ;;  %s147_s5 = int_to_ptr.vmem [resolvable:$true] %s146_s5 }
  0x11   : > { %s27_s7 = sadd.s32 1, %s712_s14  ;;  %s24_s8 = ssub.s32 %s716_s15, %s806_s6 }
  0x12   : > { %500 = dma.hbm_to_vmem [thread:$0]  (!%p498_p10), %s131_s22, 256, %s133_s25, [#allocation6], %s719_s29, %s719_s29, %s720_s30  }
  0x13   : > { %503 = dma.hbm_to_vmem [thread:$0]  (!%p498_p10), %s145_s28, 512, %s147_s5, [#allocation6], %s719_s29, %s719_s29, %s720_s30  }
  0x14   : > { %p34_p12 = scmp.ne.s32.totalorder %s712_s14, %s708_s13  ;;  %p25_p13 = scmp.eq.s32.totalorder %s24_s8, 0 }
  0x15   : > { %p35_p0 = scmp.eq.s32.totalorder %s716_s15, 0  ;;  %p514_p5 = scmp.lt.s32.totalorder %s716_s15, 2 }
  0x16   : > { %p816_p3 = por %p106_p2, %p34_p12  ;;  %s160_s11 = sand.u32 1, %s712_s14  }
  0x17   : > { %s822_s10 = scalar_select %p25_p13, %s712_s14, %s27_s7  }
  0x18   : > { %p36_p7 = por %p35_p0, %p34_p12  ;;  %s454_s17 = sshll.u32 %s160_s11, 5 }
  0x19   : > { %s478_s20 = sshll.u32 %s716_s15, 5  ;;  %s164_s25 = scalar_lea.vmem [#allocation2], %s454_s17 }
  0x1a   : > { %s170_s24 = scalar_lea.hbm %s902_s0, %s478_s20  ;;  %s173_s26 = sshll.u32 %s164_s25, 4  ;;  %s174_s26 = int_to_ptr.vmem [resolvable:$true] %s173_s26 }
  0x1b   : > { %s171_s27 = sshll.u32 %s170_s24, 4  ;;  %p829_p2 = pnand %p514_p5, %p36_p7  ;;  %s172_s27 = int_to_ptr.hbm [resolvable:$true] %s171_s27 }
  0x1c   : > { %s161_s4 = scalar_lea.sflag [#allocation3], %s160_s11  ;;  %s616_s5 = sshra.s32 %s172_s27, 4  ;;  %s617_s5 = int_to_ptr.hbm [resolvable:$true] %s616_s5 }
  0x1d   : > { %s618_s7 = scalar_lea.hbm %s617_s5, 32  ;;  %p620_p10 = pneg %p829_p2 }
  0x1e   : > { %p619_p9 = scmp.ne.s32.totalorder %s617_s5, %s618_s7  ;;  %s623_s20 = scalar_lea.hbm %s902_s0, 64 }
  0x1f   : > { %p624_p0 = scmp.lt.s32.totalorder %s617_s5, %s902_s0  ;;  %p625_p5 = scmp.lt.s32.totalorder %s623_s20, %s618_s7 }
  0x20   : > { %p621_p12 = pnand %p620_p10, %p619_p9 }
  0x21   : > { %p626_p7 = por %p625_p5, %p624_p0 }
  0x22   : > { %p622_p13 = pneg %p621_p12 }
  0x24   : > { %p627_p11 = pnand %p626_p7, %p622_p13 }
  0x26   : > { %630 = shalt.err (!%p627_p11)
}
  0x27   : > { %507 = dma.hbm_to_vmem [thread:$0]  (!%p829_p2), %s172_s27, 512, %s174_s26, %s161_s4, %s719_s29, %s719_s29, %s720_s30  }
  0x28   : > { %185 = sbr.rel (%p787_p8) target bundleno = 325 (0x145), region = 32  ;;  %s849_s11 = sand.u32 (!%p787_p8), 1, %s708_s13  }
  0x29   : > { %s459_s24 = sshll.u32 (!%p787_p8), %s849_s11, 5  ;;  %s188_s25 = scalar_lea.sflag (!%p787_p8), [#allocation3], %s849_s11 }
  0x2a   : > { %s191_s5 = scalar_lea.vmem (!%p787_p8), [#allocation2], %s459_s24 }
  0x2d   : > { %691 = dma.done.wait (%p774_p4), %s188_s25, 512  }
  0x2e   : > { %693 = vsyncadd (%p774_p4), %s188_s25, 4294966784 }
  0x2f   : > { %695 = dma.done.wait (%p41_p1), [#allocation6], 768  }
  0x30   : > { %697 = vsyncadd (%p41_p1), [#allocation6], 4294966528  ;;  %v228_v0 = vld [vmem:[%s191_s5 + $0x8] sm:$0xff]  ;;  %v230_v1 = vld [vmem:[%s191_s5 + $0x18] sm:$0xff]  ;;  %vm237_vm0 = vcmask 130048   ;;  %vm290_vm1 = vcmask 261120  }
  0x31   : > { %v227_v2 = vld [vmem:[%s191_s5] sm:$0xff]  ;;  %258 = vmatpush.msra.mxu0 %v228_v0  ;;  %281 = vmatpush.msra.mxu1 %v230_v1  ;;  %v229_v3 = vld [vmem:[%s191_s5 + $0x10] sm:$0xff]  ;;  %v236_v5 = vld [vmem:[#allocation7 + $0x18] sm:$0xff]  ;;  %s480_s18 = sshll.u32 %s765_s16, 5  ;;  %s224_s23 = scalar_lea.vmem [#allocation8], %s459_s24 }
  0x32   : > { %v231_v4 = vld [vmem:[#allocation5] sm:$0xff]  ;;  %315 = vmatpush.msra.mxu2 %v236_v5  ;;  %481 = vmatpush.msra.mxu3 %v236_v5  ;;  %v234_v7 = vld [vmem:[#allocation7 + $0x8] sm:$0xff]  ;;  %v232_v8 = vld [vmem:[#allocation5 + $0x8] sm:$0xff]  ;;  %s353_s26 = scalar_lea.hbm %s905_s3, %s480_s18  ;;  %s354_s27 = sshll.u32 %s224_s23, 4  ;;  %s355_s27 = int_to_ptr.vmem [resolvable:$true] %s354_s27 }
  0x33   : > { %259 = vmatpush.msra.mxu0 %v227_v2  ;;  %282 = vmatpush.msra.mxu1 %v229_v3  ;;  %v235_v6 = vld [vmem:[#allocation7 + $0x10] sm:$0xff]  ;;  %v233_v9 = vld [vmem:[#allocation7] sm:$0xff]  ;;  %s356_s28 = sshll.u32 %s353_s26, 4  ;;  %s341_s16 = scalar_lea.sflag [#allocation4], %s849_s11  ;;  %s357_s28 = int_to_ptr.hbm [resolvable:$true] %s356_s28 }
  0x34   : > { %463 = vmatmul.msk.f32.vlgmr.msra.gmra.mxu0 %vm237_vm0, %v231_v4  ;;  %465 = vmatmul.msk.f32.vlgmr.msra.gmra.mxu1 %vm237_vm0, %v231_v4  ;;  %s660_s4 = sshra.s32 %s357_s28, 4  ;;  %s666_s20 = scalar_lea.hbm %s905_s3, 64  ;;  %s661_s4 = int_to_ptr.hbm [resolvable:$true] %s660_s4 }
  0x35   : > { %316 = vmatpush.msra.mxu2 %v235_v6  ;;  %482 = vmatpush.msra.mxu3 %v235_v6  ;;  %s662_s7 = scalar_lea.hbm %s661_s4, 32  ;;  %p667_p11 = scmp.lt.s32.totalorder %s661_s4, %s905_s3 }
  0x36   : > { %p663_p1 = scmp.ne.s32.totalorder %s661_s4, %s662_s7  ;;  %p668_p2 = scmp.lt.s32.totalorder %s666_s20, %s662_s7 }
  0x37   : > { %317 = vmatpush.msra.mxu2 %v234_v7  ;;  %483 = vmatpush.msra.mxu3 %v234_v7 }
  0x38   : > { %p664_p4 = pnand %p663_p1, %p816_p3  ;;  %p669_p9 = por %p668_p2, %p667_p11 }
  0x39   : > { %318 = vmatpush.msra.mxu2 %v233_v9  ;;  %484 = vmatpush.msra.mxu3 %v233_v9 }
  0x3a   : > { %p665_p8 = pneg %p664_p4 }
  0x3c   : > { %464 = vmatmul.msk.f32.gmra.mxu0 %vm237_vm0, %v232_v8  ;;  %466 = vmatmul.msk.f32.gmra.mxu1 %vm237_vm0, %v232_v8  ;;  %p670_p10 = pnand %p669_p9, %p665_p8 }
  0xb1   : > { %v261_v10 = vpop.f32.mrf.mxu0  ;;  %v284_v11 = vpop.f32.mrf.mxu1 }
  0xb2   : > { %467 = vmatmul.msk.f32.vlgmr.msra.gmra.mxu2 %vm290_vm1, %v261_v10  ;;  %469 = vmatmul.msk.f32.vlgmr.msra.gmra.mxu3 %vm290_vm1, %v284_v11 }
  0xb9   : > { %v264_v12 = vpop.f32.mrf.mxu0  ;;  %v287_v13 = vpop.f32.mrf.mxu1 }
  0xba   : > { %468 = vmatmul.msk.f32.gmra.mxu2 %vm290_vm1, %v264_v12  ;;  %470 = vmatmul.msk.f32.gmra.mxu3 %vm290_vm1, %v287_v13 }
 0x135   : > { %v320_v14 = vpop.f32.mrf.mxu2  ;;  %v326_v15 = vpop.f32.mrf.mxu3 }
 0x136   : > { %v332_v16 = vmax.f32 %v320_v14, 0.0  ;;  %v334_v17 = vmax.f32 %v326_v15, 0.0 }
 0x138   : > { %336 = vst [vmem:[%s224_s23] sm:$0xff] %v332_v16 }
 0x139   : > { %338 = vst [vmem:[%s224_s23 + $0x10] sm:$0xff] %v334_v17 }
 0x13d   : > { %v323_v18 = vpop.f32.mrf.mxu2  ;;  %v329_v19 = vpop.f32.mrf.mxu3 }
 0x13e   : > { %v333_v20 = vmax.f32 %v323_v18, 0.0  ;;  %v335_v21 = vmax.f32 %v329_v19, 0.0 }
 0x140   : > { %337 = vst [vmem:[%s224_s23 + $0x8] sm:$0xff] %v333_v20 }
 0x141   : > { %339 = vst [vmem:[%s224_s23 + $0x18] sm:$0xff] %v335_v21 }
 0x142   : > { %673 = shalt.err (!%p670_p10)
}
 0x143   : > { %s722_s11 = smov 128   ;;  %s723_s24 = smov 8  }
 0x144   : > { %495 = dma.vmem_to_hbm [thread:$0]  (%p816_p3), %s355_s27, 512, %s357_s28, %s341_s16, %s722_s11, %s722_s11, %s723_s24  }
 0x145 PF: > { %s371_s25 = sand.u32 1, %s704_s12   ;;  %p911_p12 = scmp.ge.s32.totalorder %s716_s15, 2 }
 0x146   : > { %s372_s5 = scalar_lea.sflag [#allocation4], %s371_s25 }
 0x147   : > { %p509_p13 = pnand %p911_p12, %p779_p6 }
 0x149   : > { %p510_p0 = pneg %p509_p13 }
 0x14b   : > { %699 = dma.done.wait (%p510_p0), %s372_s5, 512  }
 0x14c   : > { %701 = vsyncadd (%p510_p0), %s372_s5, 4294966784  ;;  %p17_p5 = scmp.ge.s32.totalorder %s806_s6, 4   ;;  %s912_s12 = smov %s708_s13 }
 0x14d   : > { %s913_s13 = smov %s712_s14  ;;  %s914_s14 = smov %s822_s10 }
 0x14e   : > { %s915_s15 = smov %s806_s6  ;;  %19 = sbr.rel (!%p17_p5) target bundleno = 6 (0x6), region = 85 }
 0x153   :  { %378 = vsyncpa [#allocation3], 1 }
 0x154   :  { %380 = vsyncpa [#allocation3 + $0x1], 1 }
 0x155   :  { %381 = vsyncpa [#allocation6], 1 }
 0x156   :  { %382 = vsyncpa [#allocation4], 1 }
 0x157   :  { %384 = vsyncpa [#allocation4 + $0x1], 1 }

</bundles_post_ra>
